<compile_context>
chip_gen: v5e
topology: v5e:2x2
jax: 0.10.0
libtpu: 0.0.40
codegen_flags: <defaults>
</compile_context>

<pallas_src>
import math

import jax
import jax.numpy as jnp
from jax.experimental import pallas as pl
from jax.experimental.pallas import tpu as pltpu

_LANES = 128
_SUBLANES = 8
# Candidate lane widths (all multiples of 128). Wider slabs = fewer grid steps
# and long unmasked stores; prefer the widest that still leaves >= 8 rows.
_WIDTH_CANDIDATES = (4096, 2048, 1024, 512, 256, 128)
# Per-tile byte cap: 1 input + 1 output, each double-buffered => ~4x tile
# bytes of live VMEM; 4 MiB tiles keep that at ~16 MiB, inside the budget,
# and already sit at ~86% of HBM roofline for a pure copy.
_MAX_TILE_BYTES = 4 * 1024 * 1024


def _copy_kernel(x_ref, o_ref):
    # Identity copy of the current tile: this is the entire "forward" of View.
    o_ref[...] = x_ref[...]


def _resolve_view_shape(in_shape, target_shape):
    """Replicates torch.Tensor.view shape resolution (single -1 allowed)."""
    total = int(math.prod(in_shape))
    target = list(target_shape)
    neg = [i for i, d in enumerate(target) if d == -1]
    if len(neg) > 1:
        raise ValueError("only one dimension can be -1")
    if neg:
        known = int(math.prod(d for d in target if d != -1))
        if known == 0 or total % known != 0:
            raise ValueError(f"cannot view shape {in_shape} as {target_shape}")
        target[neg[0]] = total // known
    if int(math.prod(target)) != total:
        raise ValueError(f"cannot view shape {in_shape} as {target_shape}")
    return tuple(int(d) for d in target)


def _vmem_limit_bytes():
    """Scoped-VMEM budget: half of physical, capped at 32 MiB (safe on all gens)."""
    try:
        phys = int(pltpu.get_tpu_info().vmem_capacity_bytes)
    except Exception:
        phys = 64 * 1024 * 1024  # conservative: v7x physical VMEM per TC
    return min(32 * 1024 * 1024, phys // 2)


def _round_up(v, m):
    return -(-v // m) * m


def view_pallas(x, *shape):
    """Pallas equivalent of View(*shape).forward(x)."""
    target = _resolve_view_shape(x.shape, shape)
    total = int(x.size)

    # Zero-element tensors: nothing to copy; reshape is pure metadata.
    if total == 0:
        return jnp.reshape(x, target)

    # Glue: flatten row-major (matches torch contiguous-view semantics).
    flat = x.reshape(-1)

    # Pad the ragged tail (at most 127 elements) so the copy always runs as a
    # pipelined, lane-aligned 2-D slab. The aligned case (typical for
    # View(batch, -1) on conv features) takes no pad and no slice-back.
    padded_total = _round_up(total, _LANES)
    if padded_total != total:
        flat = jnp.pad(flat, (0, padded_total - total))

    # Pick the widest lane dimension that divides the padded element count,
    # preferring widths that still leave >= 8 sublane rows.
    width = _LANES
    for w in _WIDTH_CANDIDATES:
        if padded_total % w == 0 and padded_total // w >= _SUBLANES:
            width = w
            break
    else:
        for w in _WIDTH_CANDIDATES:
            if padded_total % w == 0:
                width = w
                break

    rows = padded_total // width
    x2 = flat.reshape(rows, width)

    # ---- Tile-size selection (MiB-scale tiles, VMEM-budget aware) ----------
    vmem_limit = _vmem_limit_bytes()
    itemsize = jnp.dtype(x.dtype).itemsize
    tile_bytes = min(_MAX_TILE_BYTES, vmem_limit // 5)
    max_rows = max(
        _SUBLANES, (tile_bytes // (width * itemsize)) // _SUBLANES * _SUBLANES
    )

    if rows <= _SUBLANES:
        # Block equals the full sublane extent: always a legal block shape.
        block_rows = rows
    else:
        # Largest legal block that never exceeds the array extent.
        max_block = min(max_rows, (rows // _SUBLANES) * _SUBLANES)
        # Keep >= 2 grid steps (both v7x TensorCores participate) and
        # re-balance so blocks are near-equal multiples of 8 rows.
        n_blocks = max(2, pl.cdiv(rows, max_block))
        block_rows = min(
            max_block, max(_SUBLANES, _round_up(pl.cdiv(rows, n_blocks), _SUBLANES))
        )

    grid = (pl.cdiv(rows, block_rows),)

    out2 = pl.pallas_call(
        _copy_kernel,
        out_shape=jax.ShapeDtypeStruct((rows, width), x.dtype),
        grid=grid,
        in_specs=[pl.BlockSpec((block_rows, width), lambda i: (i, 0))],
        out_specs=pl.BlockSpec((block_rows, width), lambda i: (i, 0)),
        compiler_params=pltpu.CompilerParams(
            dimension_semantics=("parallel",),
            vmem_limit_bytes=vmem_limit,
        ),
    )(x2)

    # Glue: drop padding (ragged case only) and present the target view.
    out_flat = out2.reshape(-1)
    if padded_total != total:
        out_flat = out_flat[:total]
    return out_flat.reshape(target)


class ViewPallas:
    """Mirror of the PyTorch View nn.Module (no parameters)."""

    # TODO(synk): torch .view aliases the input storage; JAX arrays are
    # immutable, so this returns a copied buffer with identical contents.

    def __init__(self, *shape):
        self.shape = shape

    def __call__(self, x):
        return view_pallas(x, *self.shape)


if __name__ == "__main__":
    key = jax.random.PRNGKey(0)

    # NCHW input, e.g. conv feature map about to be flattened for a classifier.
    x = jax.random.normal(key, (2, 4, 16, 16), dtype=jnp.float32)
    module = ViewPallas(2, -1)  # View(batch, -1): typical usage in piggyback_vgg
    ref = x.reshape(2, -1)
    out = jax.block_until_ready(module(x))
    assert out.shape == ref.shape, (out.shape, ref.shape)
    assert out.dtype == ref.dtype
    assert jnp.array_equal(out, ref)

    # Ragged (non-128-divisible) path: padded copy + slice-back.
    x2 = jax.random.normal(jax.random.PRNGKey(1), (3, 5, 7), dtype=jnp.float32)
    out2 = jax.block_until_ready(view_pallas(x2, -1, 35))
    assert jnp.array_equal(out2, x2.reshape(-1, 35))

    # Multi-block path (rows not a multiple of the block, grid > 1, edge mask).
    x3 = jax.random.normal(jax.random.PRNGKey(2), (1, 3, 40, 128), dtype=jnp.float32)
    out3 = jax.block_until_ready(view_pallas(x3, 3, -1))
    assert jnp.array_equal(out3, x3.reshape(3, -1))

    # Larger aligned path exercising the re-balanced multi-step grid.
    x4 = jax.random.normal(jax.random.PRNGKey(3), (4, 8, 32, 128), dtype=jnp.bfloat16)
    out4 = jax.block_until_ready(view_pallas(x4, 4, -1))
    assert jnp.array_equal(out4, x4.reshape(4, -1))

    print("KERNEL_OK")
</pallas_src>

<mosaic_0001>
module attributes {stable_mosaic.version = 11 : i64} {
  func.func @_copy_kernel(%arg0: i32, %arg1: memref<8x256xf32, #tpu.memory_space<vmem>>, %arg2: memref<8x256xf32, #tpu.memory_space<vmem>>) attributes {dimension_semantics = [#tpu.dimension_semantics<parallel>], iteration_bounds = array<i64: 1>, scalar_prefetch = 0 : i64, scratch_operands = 0 : i64, tpu.core_type = #tpu.core_type<tc>, window_params = [{transform_indices = @transform_0, window_bounds = array<i64: 8, 256>}, {transform_indices = @transform_1, window_bounds = array<i64: 8, 256>}]} {
    %c0 = arith.constant 0 : index
    %c0_0 = arith.constant 0 : index
    %0 = vector.load %arg1[%c0, %c0_0] : memref<8x256xf32, #tpu.memory_space<vmem>>, vector<8x256xf32>
    %c0_1 = arith.constant 0 : index
    %c0_2 = arith.constant 0 : index
    %1 = vector.load %arg2[%c0_1, %c0_2] : memref<8x256xf32, #tpu.memory_space<vmem>>, vector<8x256xf32>
    tpu.vector_store %arg2[%c0_1, %c0_2], %0 {strides = array<i32>} : memref<8x256xf32, #tpu.memory_space<vmem>>, vector<8x256xf32>,
    return
  }
  func.func @transform_0(%arg0: i32) -> (i32, i32) {
    %c0_i32 = arith.constant 0 : i32
    %c0_i32_0 = arith.constant 0 : i32
    return %arg0, %c0_i32 : i32, i32
  }
  func.func @transform_1(%arg0: i32) -> (i32, i32) {
    %c0_i32 = arith.constant 0 : i32
    %c0_i32_0 = arith.constant 0 : i32
    return %arg0, %c0_i32 : i32, i32
  }
}

</mosaic_0001>

<bundles_post_ra>
// kernel: tpu_custom_call.1
= control target key start
LH: loop header
LB: loop body
LE: loop exit
PB: predicated region body
PF: predicated region fallthrough
CT: control target
= control target key end

     0   :  { %6 = vsyncpa [#allocation3], 0  ;;  %s116_s0 = inlined_call_operand.hbm [shape: f32[8,256], index: 0, kind: input, shape index: {}]   ;;  %s117_s1 = inlined_call_operand.hbm [shape: f32[8,256], index: 1, kind: output, shape index: {}]  }
   0x1   :  { %7 = vsyncpa [#allocation4], 0  ;;  %s13_s8 = sshll.u32 %s116_s0, 4  ;;  %s98_s9 = smov [#allocation2]   ;;  %s14_s8 = int_to_ptr.hbm [resolvable:$true] %s13_s8 }
   0x2   :  { %s15_s10 = sshll.u32 %s98_s9, 4  ;;  %s16_s10 = int_to_ptr.vmem [resolvable:$true] %s15_s10 }
   0x3   :  { %18 = dma.hbm_to_vmem [thread:$0]  %s14_s8, 256, %s16_s10, [#allocation3]  }
   0x4   :  { %94 = dma.done.wait [#allocation3], 256  }
   0x5   :  { %95 = vsyncadd [#allocation3], 4294967040  ;;  %s99_s11 = smov [#allocation5]   ;;  %s34_s15 = sshll.u32 %s117_s1, 4  ;;  %v23_v0 = vld [vmem:[#allocation2] sm:$0xff]  ;;  %v24_v1 = vld [vmem:[#allocation2 + $0x8] sm:$0xff]  ;;  %s35_s15 = int_to_ptr.hbm [resolvable:$true] %s34_s15 }
   0x6   :  { %s32_s12 = sshll.u32 %s99_s11, 4  ;;  %25 = vst [vmem:[#allocation5] sm:$0xff] %v23_v0  ;;  %s33_s12 = int_to_ptr.vmem [resolvable:$true] %s32_s12 }
   0x7   :  { %26 = vst [vmem:[#allocation5 + $0x8] sm:$0xff] %v24_v1 }
   0x8   :  { %37 = dma.vmem_to_hbm [thread:$0]  %s33_s12, 256, %s35_s15, [#allocation4]  }
   0x9   :  { %96 = dma.done.wait [#allocation4], 256  }
   0xa   :  { %97 = vsyncadd [#allocation4], 4294967040 }
   0xb   :  { %42 = vsyncpa [#allocation3], 1 }
   0xc   :  { %43 = vsyncpa [#allocation4], 1 }

</bundles_post_ra>
